<compile_context>
chip_gen: v6e
topology: v6e:2x2x1
jax: 0.10.0
libtpu: 0.0.40
codegen_flags: <defaults>
</compile_context>

<pallas_src>
import math

import jax
import jax.numpy as jnp
from jax.experimental import pallas as pl
from jax.experimental.pallas import tpu as pltpu


def _round_up(x, m):
    return -(-x // m) * m


def _patch_embed_kernel(x_ref, w_ref, pe_ref, o_ref):
    # x_ref : [TB, P, L]  f32   (TB batch*var slices per grid step)
    # w_ref : [L, D]      bf16  (resident: constant index_map)
    # pe_ref: [P, D]      f32   (resident: constant index_map)
    # o_ref : [TB, P, D]  f32
    tb, p, l = x_ref.shape
    d = o_ref.shape[-1]

    # Cast to bf16 in VMEM (VPU slot, free at mem-bound) so the MXU runs a
    # single bf16 pass with f32 accumulation.  The (TB, P) -> (TB*P) collapse
    # is a free relayout when P % 8 == 0; when it is not, the reshapes imply
    # in-VMEM relayout copies which are hidden under the much larger HBM
    # output writeback (VMEM bandwidth >> HBM bandwidth).
    x2 = x_ref[...].astype(jnp.bfloat16).reshape(tb * p, l)
    proj = jnp.dot(x2, w_ref[...], preferred_element_type=jnp.float32)  # [TB*P, D]

    out = proj.reshape(tb, p, d) + pe_ref[...][None]                    # f32 add
    o_ref[...] = out.astype(o_ref.dtype)


def sinusoidal_positional_embedding(num_positions, d_model, dtype=jnp.float32):
    """Matches the standard PositionalEmbedding used in TimeXer/TSLib."""
    position = jnp.arange(num_positions, dtype=jnp.float32)[:, None]          # [P, 1]
    div_term = jnp.exp(
        jnp.arange(0, d_model, 2, dtype=jnp.float32) * -(math.log(10000.0) / d_model)
    )
    pe = jnp.zeros((num_positions, d_model), dtype=jnp.float32)
    pe = pe.at[:, 0::2].set(jnp.sin(position * div_term))
    # Guard odd d_model: cos fills only floor(d_model/2) columns.
    pe = pe.at[:, 1::2].set(jnp.cos(position * div_term)[:, : d_model // 2])
    return pe.astype(dtype)


def _vmem_config():
    """Generation-aware (vmem_limit_bytes, tiling budget)."""
    limit, budget = 48 << 20, 36 << 20               # safe for v7x (64 MiB physical)
    try:
        cap = int(pltpu.get_tpu_info().vmem_capacity_bytes)
        if cap >= (100 << 20):                        # v5e / v6e: 128 MiB physical
            limit, budget = 96 << 20, 72 << 20
        else:                                         # v7x-class: 64 MiB physical
            limit = min(48 << 20, cap * 3 // 4)
            budget = min(36 << 20, cap // 2)
    except Exception:
        pass
    return limit, budget


def _divisors(n):
    ds = set()
    i = 1
    while i * i <= n:
        if n % i == 0:
            ds.add(i)
            ds.add(n // i)
        i += 1
    return sorted(ds)


def _choose_block_rows(bn, p, l, d_pad, vmem_budget_bytes):
    """Pick TB (batch*var slices per grid step).

    Uses the *physical* (8,128)-tiled VMEM footprint: the (TB, P, L) input
    block is lane-padded L->128 and sublane-padded P->mult-of-8; the output
    and positional-embedding blocks are sublane-padded P->mult-of-8.  All
    pipelined buffers are counted double-buffered.  TB is always a divisor of
    BN so no wrapper-side padding / output slicing is ever needed.
    """
    p8 = _round_up(p, 8)
    l_lane = _round_up(l, 128)
    in_row = 2 * p8 * l_lane * 4                      # f32 input, dbl-buffered
    out_row = 2 * p8 * d_pad * 4                      # f32 output, dbl-buffered
    fixed = 2 * _round_up(l, 16) * d_pad * 2 + 2 * p8 * d_pad * 4  # w (bf16) + pe (f32)
    tb_max = (vmem_budget_bytes - fixed) // (in_row + out_row)
    tb_max = max(1, min(int(tb_max), bn))

    divs = [d for d in _divisors(bn) if d <= tb_max]
    tb = divs[-1] if divs else 1                      # largest divisor that fits VMEM

    # Prefer >= 4 grid steps (double-buffer overlap; both v7x TensorCores get
    # work) as long as each step still writes >= ~4 MiB of output so the
    # ~0.35 us/step overhead stays negligible.
    if bn // tb < 4:
        out_bytes_per_row = p * d_pad * 4
        piped = [d for d in divs if bn // d >= 4 and d * out_bytes_per_row >= (4 << 20)]
        if piped:
            tb = piped[-1]
    return int(tb)


def patch_embedding_forward(x, weight, patch_len, d_model):
    """
    x      : [B, n_vars, seq_len]   float32
    weight : [d_model, patch_len]   (PyTorch nn.Linear weight layout)
    returns (out [B*n_vars, num_patches, d_model], n_vars)
    """
    B, n_vars, seq_len = x.shape
    P = seq_len // patch_len          # unfold with step == size keeps only full patches
    L = patch_len
    BN = B * n_vars

    # unfold + reshape (pure metadata glue, no compute)
    patches = x[:, :, : P * L].reshape(BN, P, L)

    # Lane-dense output: pad d_model up to a multiple of 128 only if needed
    # (typical TimeXer d_model = 128/256/512 takes no pad/slice path at all).
    D_pad = _round_up(d_model, 128)
    w_t = weight.T.astype(jnp.bfloat16)                          # [L, D] tiny, resident
    pe = sinusoidal_positional_embedding(P, d_model)             # [P, D] f32, resident
    if D_pad != d_model:
        w_t = jnp.pad(w_t, ((0, 0), (0, D_pad - d_model)))
        pe = jnp.pad(pe, ((0, 0), (0, D_pad - d_model)))

    vmem_limit, vmem_budget = _vmem_config()
    TB = _choose_block_rows(BN, P, L, D_pad, vmem_budget)

    out = pl.pallas_call(
        _patch_embed_kernel,
        out_shape=jax.ShapeDtypeStruct((BN, P, D_pad), x.dtype),
        grid_spec=pltpu.PrefetchScalarGridSpec(
            num_scalar_prefetch=0,
            grid=(BN // TB,),
            in_specs=[
                pl.BlockSpec((TB, P, L), lambda b: (b, 0, 0)),   # TB slices per step
                pl.BlockSpec((L, D_pad), lambda b: (0, 0)),      # full weight, resident
                pl.BlockSpec((P, D_pad), lambda b: (0, 0)),      # full pos-emb, resident
            ],
            out_specs=pl.BlockSpec((TB, P, D_pad), lambda b: (b, 0, 0)),
        ),
        compiler_params=pltpu.CompilerParams(
            dimension_semantics=("parallel",),
            vmem_limit_bytes=vmem_limit,
        ),
    )(patches, w_t, pe)

    if D_pad != d_model:
        out = out[:, :, :d_model]

    # TODO(synk): nn.Dropout is identity in eval mode; training-mode dropout not emitted.
    return out, n_vars


if __name__ == "__main__":
    # Small shapes consistent with the module's forward:
    # P = 64/8 = 8 patches, d_model = 128 (multiple of 128 -> no pad/slice path).
    B, n_vars, seq_len = 2, 4, 64
    patch_len, d_model = 8, 128
    dropout = 0.1  # unused (eval mode)

    key = jax.random.PRNGKey(0)
    k_x, k_w = jax.random.split(key)

    x = jax.random.normal(k_x, (B, n_vars, seq_len), dtype=jnp.float32)
    # Deterministic synthetic Linear weight, PyTorch layout [d_model, patch_len].
    weight = jax.random.normal(k_w, (d_model, patch_len), dtype=jnp.float32) * (
        1.0 / math.sqrt(patch_len)
    )

    out, nv = patch_embedding_forward(x, weight, patch_len, d_model)
    out = jax.block_until_ready(out)

    # Reference check in plain JAX (f32; kernel uses bf16 MXU inputs with f32
    # accumulate, hence the tolerance).
    num_patches = seq_len // patch_len
    patches_ref = x[:, :, : num_patches * patch_len].reshape(
        B * n_vars, num_patches, patch_len
    )
    ref = jnp.einsum("bpl,dl->bpd", patches_ref, weight) + sinusoidal_positional_embedding(
        num_patches, d_model
    )[None]
    assert out.shape == (B * n_vars, num_patches, d_model)
    assert nv == n_vars
    max_err = float(jnp.max(jnp.abs(out - ref)))
    assert jnp.allclose(out, ref, atol=5e-2, rtol=5e-2), max_err

    print("KERNEL_OK")
</pallas_src>

<mosaic_0001>
module attributes {stable_mosaic.version = 11 : i64} {
  func.func @_patch_embed_kernel(%arg0: i32, %arg1: memref<8x8x8xf32, #tpu.memory_space<vmem>>, %arg2: memref<8x128xbf16, #tpu.memory_space<vmem>>, %arg3: memref<8x128xf32, #tpu.memory_space<vmem>>, %arg4: memref<8x8x128xf32, #tpu.memory_space<vmem>>) attributes {dimension_semantics = [#tpu.dimension_semantics<parallel>], iteration_bounds = array<i64: 1>, scalar_prefetch = 0 : i64, scratch_operands = 0 : i64, tpu.core_type = #tpu.core_type<tc>, window_params = [{transform_indices = @transform_0, window_bounds = array<i64: 8, 8, 8>}, {pipeline_mode = #tpu.pipeline_mode<synchronous>, transform_indices = @transform_1, window_bounds = array<i64: 8, 128>}, {pipeline_mode = #tpu.pipeline_mode<synchronous>, transform_indices = @transform_2, window_bounds = array<i64: 8, 128>}, {transform_indices = @transform_3, window_bounds = array<i64: 8, 8, 128>}]} {
    %c0 = arith.constant 0 : index
    %c0_0 = arith.constant 0 : index
    %c0_1 = arith.constant 0 : index
    %0 = vector.load %arg1[%c0, %c0_0, %c0_1] : memref<8x8x8xf32, #tpu.memory_space<vmem>>, vector<8x8x8xf32>
    %1 = arith.truncf %0 : vector<8x8x8xf32> to vector<8x8x8xbf16>
    %2 = vector.shape_cast %1 : vector<8x8x8xbf16> to vector<64x8xbf16>
    %c0_2 = arith.constant 0 : index
    %c0_3 = arith.constant 0 : index
    %3 = vector.load %arg2[%c0_2, %c0_3] : memref<8x128xbf16, #tpu.memory_space<vmem>>, vector<8x128xbf16>
    %cst = arith.constant dense<0.000000e+00> : vector<64x128xf32>
    %4 = tpu.matmul %2, %3, %cst {dimension_numbers = #tpu.dot_dimension_numbers<[1], [0], [0], [1], [0, 0, 1, 1], [], []>} : vector<64x8xbf16>, vector<8x128xbf16>, vector<64x128xf32> -> vector<64x128xf32>
    %5 = vector.shape_cast %4 : vector<64x128xf32> to vector<8x8x128xf32>
    %c0_4 = arith.constant 0 : index
    %c0_5 = arith.constant 0 : index
    %6 = vector.load %arg3[%c0_4, %c0_5] : memref<8x128xf32, #tpu.memory_space<vmem>>, vector<8x128xf32>
    %7 = vector.shape_cast %6 : vector<8x128xf32> to vector<1x8x128xf32>
    %8 = vector.broadcast %7 : vector<1x8x128xf32> to vector<8x8x128xf32>
    %9 = arith.addf %5, %8 : vector<8x8x128xf32>
    %c0_6 = arith.constant 0 : index
    %c0_7 = arith.constant 0 : index
    %c0_8 = arith.constant 0 : index
    %10 = vector.load %arg4[%c0_6, %c0_7, %c0_8] : memref<8x8x128xf32, #tpu.memory_space<vmem>>, vector<8x8x128xf32>
    tpu.vector_store %arg4[%c0_6, %c0_7, %c0_8], %9 {strides = array<i32>} : memref<8x8x128xf32, #tpu.memory_space<vmem>>, vector<8x8x128xf32>,
    return
  }
  func.func @transform_0(%arg0: i32) -> (i32, i32, i32) {
    %c0_i32 = arith.constant 0 : i32
    %c0_i32_0 = arith.constant 0 : i32
    %c0_i32_1 = arith.constant 0 : i32
    return %arg0, %c0_i32, %c0_i32_0 : i32, i32, i32
  }
  func.func @transform_1(%arg0: i32) -> (i32, i32) {
    %c0_i32 = arith.constant 0 : i32
    %c0_i32_0 = arith.constant 0 : i32
    %c0_i32_1 = arith.constant 0 : i32
    return %c0_i32, %c0_i32_0 : i32, i32
  }
  func.func @transform_2(%arg0: i32) -> (i32, i32) {
    %c0_i32 = arith.constant 0 : i32
    %c0_i32_0 = arith.constant 0 : i32
    %c0_i32_1 = arith.constant 0 : i32
    return %c0_i32, %c0_i32_0 : i32, i32
  }
  func.func @transform_3(%arg0: i32) -> (i32, i32, i32) {
    %c0_i32 = arith.constant 0 : i32
    %c0_i32_0 = arith.constant 0 : i32
    %c0_i32_1 = arith.constant 0 : i32
    return %arg0, %c0_i32, %c0_i32_0 : i32, i32, i32
  }
}

</mosaic_0001>

<bundles_post_ra>
// kernel: tpu_custom_call.1
= control target key start
LH: loop header
LB: loop body
LE: loop exit
PB: predicated region body
PF: predicated region fallthrough
CT: control target
= control target key end

     0   :  { %8 = vsyncpa [#allocation3], 0  ;;  %s378_s0 = inlined_call_operand.hbm [shape: f32[8,8,8], index: 0, kind: input, shape index: {}]   ;;  %s379_s1 = inlined_call_operand.hbm [shape: bf16[8,128], index: 1, kind: input, shape index: {}]   ;;  %s380_s2 = inlined_call_operand.hbm [shape: f32[8,128], index: 2, kind: input, shape index: {}]   ;;  %s381_s3 = inlined_call_operand.hbm [shape: f32[8,8,128], index: 3, kind: output, shape index: {}]  }
   0x1   :  { %9 = vsyncpa [#allocation6], 0 }
   0x2   :  { %10 = vsyncpa [#allocation4], 0  ;;  %s330_s12 = smov [#allocation5]   ;;  %s331_s14 = smov [#allocation2]  }
   0x3   :  { %s29_s13 = sshll.u32 %s330_s12, 4  ;;  %s16_s15 = sshll.u32 %s331_s14, 4  ;;  %s30_s13 = int_to_ptr.vmem [resolvable:$true] %s29_s13  ;;  %s17_s15 = int_to_ptr.vmem [resolvable:$true] %s16_s15 }
   0x4   :  { %s252_s16 = scalar_lea.vmem %s30_s13, 64  ;;  %p257_p1 = scmp.lt.s32.totalorder %s30_s13, %s30_s13 }
   0x5   :  { %p253_p0 = scmp.ne.s32.totalorder %s30_s13, %s252_s16  ;;  %p258_p2 = scmp.lt.s32.totalorder %s252_s16, %s252_s16 }
   0x7   :  { %p259_p3 = por %p258_p2, %p257_p1 }
   0x9   :  { %p260_p4 = pnand %p259_p3, %p253_p0 }
   0xb   :  { %263 = shalt.err (!%p260_p4)
}
   0xc   :  { %32 = dma.hbm_to_vmem [thread:$0]  %s379_s1, 64, %s30_s13, [#allocation6]  }
   0xd   :  { %s272_s19 = scalar_lea.vmem %s17_s15, 1024  ;;  %p277_p6 = scmp.lt.s32.totalorder %s17_s15, %s17_s15 }
   0xe   :  { %p273_p5 = scmp.ne.s32.totalorder %s17_s15, %s272_s19  ;;  %p278_p7 = scmp.lt.s32.totalorder %s272_s19, %s272_s19 }
  0x10   :  { %p279_p8 = por %p278_p7, %p277_p6 }
  0x12   :  { %p280_p9 = pnand %p279_p8, %p273_p5 }
  0x14   :  { %283 = shalt.err (!%p280_p9)
}
  0x15   :  { %s332_s20 = smov 128   ;;  %s333_s21 = smov 8  }
  0x16   :  { %22 = dma.hbm_to_vmem [thread:$0]  %s378_s0, 1024, %s17_s15, [#allocation3], %s332_s20, %s332_s20, %s333_s21  }
  0x17   :  { %s334_s24 = smov [#allocation7]  }
  0x18   :  { %s39_s25 = sshll.u32 %s334_s24, 4  ;;  %s40_s25 = int_to_ptr.vmem [resolvable:$true] %s39_s25 }
  0x19   :  { %s292_s1 = scalar_lea.vmem %s40_s25, 128  ;;  %p297_p11 = scmp.lt.s32.totalorder %s40_s25, %s40_s25 }
  0x1a   :  { %p293_p10 = scmp.ne.s32.totalorder %s40_s25, %s292_s1  ;;  %p298_p12 = scmp.lt.s32.totalorder %s292_s1, %s292_s1 }
  0x1c   :  { %p299_p13 = por %p298_p12, %p297_p11 }
  0x1e   :  { %p300_p0 = pnand %p299_p13, %p293_p10 }
  0x20   :  { %303 = shalt.err (!%p300_p0)
}
  0x21   :  { %42 = dma.hbm_to_vmem [thread:$0]  %s380_s2, 128, %s40_s25, [#allocation6]  }
  0x22   :  { %324 = dma.done.wait [#allocation3], 1024  }
  0x23   :  { %325 = vsyncadd [#allocation3], 4294966272 }
  0x24   :  { %326 = dma.done.wait [#allocation6], 192  }
  0x25   :  { %327 = vsyncadd [#allocation6], 4294967104  ;;  %vm103_vm0 = vcmask 1043456   ;;  %v69_v0 = vld [vmem:[#allocation5] sm:$0xf]  ;;  %v54_v2 = vld [vmem:[#allocation2 + $0x8] sm:$0xff] }
  0x26   :  { %v53_v1 = vld [vmem:[#allocation2] sm:$0xff]  ;;  %vm90_vm1 = vcmask 64512   ;;  %236 = vmatprep.subr.msk.bf16.mxu0 %vm103_vm0, %v69_v0  ;;  %237 = vmatprep.subr.msk.bf16.mxu1 %vm103_vm0, %v69_v0  ;;  %v105_v3 = vsel %vm103_vm0, %v69_v0, 0  ;;  %v58_v6 = vld [vmem:[#allocation2 + $0x28] sm:$0xff]  ;;  %v55_v7 = vld [vmem:[#allocation2 + $0x10] sm:$0xff]  ;;  %s335_s0 = smov [#allocation8]  }
  0x27   :  { %v215_v4 = vpack.c.bf16 %v54_v2, %v53_v1  ;;  %v57_v5 = vld [vmem:[#allocation2 + $0x20] sm:$0xff]  ;;  %225 = vmatpush3.bf16.msra.mxu0 %v105_v3  ;;  %235 = vmatpush3.bf16.msra.mxu1 %v105_v3  ;;  %v56_v9 = vld [vmem:[#allocation2 + $0x18] sm:$0xff]  ;;  %v59_v10 = vld [vmem:[#allocation2 + $0x30] sm:$0xff]  ;;  %s194_s2 = sshll.u32 %s335_s0, 4  ;;  %s195_s2 = int_to_ptr.vmem [resolvable:$true] %s194_s2 }
  0x28   :  { %v217_v8 = vpack.c.bf16 %v58_v6, %v57_v5  ;;  %v60_v11 = vld [vmem:[#allocation2 + $0x38] sm:$0xff]  ;;  %v216_v12 = vpack.c.bf16 %v56_v9, %v55_v7  ;;  %v172_v14 = vld [vmem:[#allocation7] sm:$0xff]  ;;  %s304_s28 = scalar_lea.vmem %s195_s2, 1024  ;;  %p309_p2 = scmp.lt.s32.totalorder %s195_s2, %s195_s2 }
  0x29   :  { %226 = vmatprep.mubr.msk.bf16.mxu0 %vm90_vm1, %v215_v4  ;;  %v218_v13 = vpack.c.bf16 %v60_v11, %v59_v10  ;;  %p305_p1 = scmp.ne.s32.totalorder %s195_s2, %s304_s28  ;;  %p310_p3 = scmp.lt.s32.totalorder %s304_s28, %s304_s28 }
  0x2a   :  { %230 = vmatprep.mubr.msk.bf16.mxu1 %vm90_vm1, %v217_v8  ;;  %227 = vmatmul.mubr.msk.bf16.vlgmr.msra.gmra.mxu0 %vm90_vm1, %v216_v12 }
  0x2b   :  { %231 = vmatmul.mubr.msk.bf16.vlgmr.msra.gmra.mxu1 %vm90_vm1, %v218_v13  ;;  %p311_p4 = por %p310_p3, %p309_p2 }
  0x2d   :  { %p312_p5 = pnand %p311_p4, %p305_p1 }
  0xea   :  { %v228_v15 = vpop.f32.mrf.mxu0 }
  0xeb   :  { %v232_v16 = vpop.f32.mrf.mxu1  ;;  %v175_v17 = vadd.f32 %v228_v15, %v172_v14 }
  0xec   :  { %v179_v18 = vadd.f32 %v232_v16, %v172_v14  ;;  %v141_v19 = vpop.f32.mrf.mxu0 }
  0xed   :  { %v157_v20 = vpop.f32.mrf.mxu1  ;;  %183 = vst [vmem:[#allocation8 + $0x10] sm:$0xff] %v175_v17  ;;  %v173_v21 = vadd.f32 %v172_v14, %v141_v19 }
  0xee   :  { %187 = vst [vmem:[#allocation8 + $0x30] sm:$0xff] %v179_v18  ;;  %v177_v22 = vadd.f32 %v172_v14, %v157_v20  ;;  %v229_v23 = vpop.f32.mrf.mxu0 }
  0xef   :  { %v233_v24 = vpop.f32.mrf.mxu1  ;;  %181 = vst [vmem:[#allocation8] sm:$0xff] %v173_v21  ;;  %v176_v25 = vadd.f32 %v229_v23, %v172_v14 }
  0xf0   :  { %185 = vst [vmem:[#allocation8 + $0x20] sm:$0xff] %v177_v22  ;;  %v180_v26 = vadd.f32 %v233_v24, %v172_v14  ;;  %v144_v27 = vpop.f32.mrf.mxu0 }
  0xf1   :  { %v160_v28 = vpop.f32.mrf.mxu1  ;;  %184 = vst [vmem:[#allocation8 + $0x18] sm:$0xff] %v176_v25  ;;  %v174_v29 = vadd.f32 %v172_v14, %v144_v27 }
  0xf2   :  { %188 = vst [vmem:[#allocation8 + $0x38] sm:$0xff] %v180_v26  ;;  %v178_v30 = vadd.f32 %v172_v14, %v160_v28 }
  0xf3   :  { %182 = vst [vmem:[#allocation8 + $0x8] sm:$0xff] %v174_v29 }
  0xf4   :  { %186 = vst [vmem:[#allocation8 + $0x28] sm:$0xff] %v178_v30 }
  0xf5   :  { %315 = shalt.err (!%p312_p5)
}
  0xf6   :  { %200 = dma.vmem_to_hbm [thread:$0]  %s195_s2, 1024, %s381_s3, [#allocation4], %s332_s20, %s332_s20, %s333_s21  }
  0xf7   :  { %328 = dma.done.wait [#allocation4], 1024  }
  0xf8   :  { %329 = vsyncadd [#allocation4], 4294966272 }
  0xf9   :  { %204 = vsyncpa [#allocation3], 1 }
  0xfa   :  { %205 = vsyncpa [#allocation6], 1 }
  0xfb   :  { %206 = vsyncpa [#allocation4], 1 }

</bundles_post_ra>
